<compile_context>
chip_gen: v7x
topology: tpu7x:2x2x1
jax: 0.10.0
libtpu: 0.0.40
codegen_flags: <defaults>
</compile_context>

<pallas_src>
import functools

import jax
import jax.numpy as jnp
from jax.experimental import pallas as pl
from jax.experimental.pallas import tpu as pltpu

K = 9                 # taps
PAD = 4               # per-conv 'same' padding
HALO = 128            # lane-aligned halo fetched from each neighbor tile (only 8 are needed)
SM_KERNEL = (0.05, 0.075, 0.1, 0.175, 0.2, 0.175, 0.1, 0.075, 0.05)


def _smoother_kernel(xl_ref, xc_ref, xr_ref, o_ref, *, length, tile):
    """Fused double 9-tap 'same' conv on one L-tile. Refs are (1, HALO)/(1, tile) f32."""
    tile_start = pl.program_id(0) * tile

    # Working window covering [tile_start - HALO, tile_start + tile + HALO).
    # Read each ref exactly once; all shifted taps below slice this VALUE.
    xf = jnp.concatenate([xl_ref[...], xc_ref[...], xr_ref[...]], axis=1).astype(jnp.float32)

    # conv #1 zero-padding: x outside [0, L) is 0 (also neutralizes clamped edge halos).
    col = jax.lax.broadcasted_iota(jnp.int32, xf.shape, 1)
    g = tile_start - HALO + col
    xf = jnp.where((g >= 0) & (g < length), xf, 0.0)

    # Pass 1: y1 on global positions [tile_start - PAD, tile_start + tile + PAD).
    ext = tile + 2 * PAD
    acc1 = jnp.zeros((1, ext), jnp.float32)
    for k in range(K):                       # unrolled; pure VPU shifted FMA chain
        s = HALO - 2 * PAD + k
        acc1 = acc1 + SM_KERNEL[k] * xf[:, s:s + ext]

    # conv #2 zero-pads conv #1's length-L output, so y1 outside [0, L) must be 0.
    col1 = jax.lax.broadcasted_iota(jnp.int32, (1, ext), 1)
    g1 = tile_start - PAD + col1
    acc1 = jnp.where((g1 >= 0) & (g1 < length), acc1, 0.0)

    # Pass 2: output on [tile_start, tile_start + tile).
    acc2 = jnp.zeros((1, tile), jnp.float32)
    for k in range(K):
        acc2 = acc2 + SM_KERNEL[k] * acc1[:, k:k + tile]

    o_ref[...] = acc2.astype(o_ref.dtype)    # lane-dense (tile % 128 == 0) store


def smoother(x, *, tile=None):
    """Pallas equivalent of the PyTorch `smoother` module. x: 1-D f32 signal, returns (L,)."""
    # The torch forward only works for a single 1-channel signal; flatten any size-1 dims.
    x = jnp.asarray(x, jnp.float32).reshape(-1)
    L = x.shape[0]

    if tile is None:
        tile = min(2048, max(128, pl.cdiv(L, 128) * 128))
    assert tile % 128 == 0
    Lp = pl.cdiv(L, tile) * tile
    nt = Lp // tile
    t128 = tile // 128
    nb = Lp // 128

    # Only round L up to the tile size (the zeros past L are masked in-kernel anyway);
    # no (L + 2*PAD) padded slab / extra full-size HBM round trip.
    xp = jnp.pad(x, (0, Lp - L)).reshape(1, Lp)

    kernel = functools.partial(_smoother_kernel, length=L, tile=tile)

    out = pl.pallas_call(
        kernel,
        out_shape=jax.ShapeDtypeStruct((1, Lp), jnp.float32),
        grid=(nt,),
        in_specs=[
            # 128-lane halo blocks from the left / right neighbor tile (clamped at the
            # edges; the clamped garbage is zeroed by the in-kernel global-index mask).
            pl.BlockSpec((1, HALO), lambda i: (0, jnp.maximum(i * t128 - 1, 0))),
            pl.BlockSpec((1, tile), lambda i: (0, i)),
            pl.BlockSpec((1, HALO), lambda i: (0, jnp.minimum((i + 1) * t128, nb - 1))),
        ],
        out_specs=pl.BlockSpec((1, tile), lambda i: (0, i)),
        compiler_params=pltpu.CompilerParams(
            dimension_semantics=("parallel",),        # shard tiles across v7x's 2 TCs
            vmem_limit_bytes=32 * 1024 * 1024,        # tiny per-step footprint; safe on 64 MiB v7x
        ),
        cost_estimate=pl.CostEstimate(
            flops=2 * 2 * K * L,            # two 9-tap mul+add passes
            transcendentals=0,
            bytes_accessed=2 * 4 * L,       # read + write, f32
        ),
    )(xp, xp, xp)

    return out[0, :L]


if __name__ == "__main__":
    key = jax.random.PRNGKey(0)
    L = 300                      # small, not a multiple of 128 -> exercises edge masking + padded tail
    x = jax.random.normal(key, (L,), jnp.float32)

    # Multi-tile path: 3 tiles of 128 with halos.
    y = jax.block_until_ready(smoother(x, tile=128))

    # Reference: exact PyTorch semantics (cross-correlation, zero padding=4, applied twice).
    w = jnp.asarray(SM_KERNEL, jnp.float32)

    def conv_same(v):
        vp = jnp.pad(v, (PAD, PAD))
        return sum(w[k] * vp[k:k + v.shape[0]] for k in range(K))

    y_ref = conv_same(conv_same(x))

    assert y.shape == (L,)
    assert jnp.allclose(y, y_ref, atol=1e-5, rtol=1e-5)

    # Also check the default (single-tile) path.
    y2 = jax.block_until_ready(smoother(x))
    assert jnp.allclose(y2, y_ref, atol=1e-5, rtol=1e-5)

    print("KERNEL_OK")
</pallas_src>

<mosaic_0001>
module attributes {stable_mosaic.version = 11 : i64} {
  func.func @_smoother_kernel(%arg0: i32, %arg1: memref<1x128xf32, #tpu.memory_space<vmem>>, %arg2: memref<1x128xf32, #tpu.memory_space<vmem>>, %arg3: memref<1x128xf32, #tpu.memory_space<vmem>>, %arg4: memref<1x128xf32, #tpu.memory_space<vmem>>) attributes {dimension_semantics = [#tpu.dimension_semantics<parallel>], iteration_bounds = array<i64: 3>, scalar_prefetch = 0 : i64, scratch_operands = 0 : i64, tpu.core_type = #tpu.core_type<tc>, window_params = [{transform_indices = @transform_0, window_bounds = array<i64: 1, 128>}, {transform_indices = @transform_1, window_bounds = array<i64: 1, 128>}, {transform_indices = @transform_2, window_bounds = array<i64: 1, 128>}, {transform_indices = @transform_3, window_bounds = array<i64: 1, 128>}]} {
    %c128_i32 = arith.constant 128 : i32
    %0 = arith.muli %arg0, %c128_i32 : i32
    %c0 = arith.constant 0 : index
    %c0_0 = arith.constant 0 : index
    %1 = vector.load %arg1[%c0, %c0_0] : memref<1x128xf32, #tpu.memory_space<vmem>>, vector<1x128xf32>
    %c0_1 = arith.constant 0 : index
    %c0_2 = arith.constant 0 : index
    %2 = vector.load %arg2[%c0_1, %c0_2] : memref<1x128xf32, #tpu.memory_space<vmem>>, vector<1x128xf32>
    %c0_3 = arith.constant 0 : index
    %c0_4 = arith.constant 0 : index
    %3 = vector.load %arg3[%c0_3, %c0_4] : memref<1x128xf32, #tpu.memory_space<vmem>>, vector<1x128xf32>
    %4 = tpu.concatenate %1, %2, %3 in 1 : vector<1x128xf32>, vector<1x128xf32>, vector<1x128xf32> -> vector<1x384xf32>
    %5 = tpu.iota {dimensions = array<i32: 1>} : vector<1x384xi32>
    %c128_i32_5 = arith.constant 128 : i32
    %6 = arith.subi %0, %c128_i32_5 : i32
    %7 = vector.broadcast %6 : i32 to vector<1x384xi32>
    %8 = arith.addi %7, %5 : vector<1x384xi32>
    %c0_i32 = arith.constant 0 : i32
    %9 = vector.broadcast %c0_i32 : i32 to vector<1x384xi32>
    %10 = arith.cmpi sge, %8, %9 : vector<1x384xi32>
    %c300_i32 = arith.constant 300 : i32
    %11 = vector.broadcast %c300_i32 : i32 to vector<1x384xi32>
    %12 = arith.cmpi slt, %8, %11 : vector<1x384xi32>
    %13 = arith.andi %10, %12 : vector<1x384xi1>
    %cst = arith.constant 0.000000e+00 : f32
    %14 = vector.broadcast %cst : f32 to vector<1x384xf32>
    %15 = arith.select %13, %4, %14 : vector<1x384xi1>, vector<1x384xf32>
    %cst_6 = arith.constant 0.000000e+00 : f32
    %16 = vector.broadcast %cst_6 : f32 to vector<1x136xf32>
    %17 = vector.extract_strided_slice %15 {offsets = [0, 120], sizes = [1, 136], strides = [1, 1]} : vector<1x384xf32> to vector<1x136xf32>
    %cst_7 = arith.constant 5.000000e-02 : f32
    %18 = vector.broadcast %cst_7 : f32 to vector<1x136xf32>
    %19 = arith.mulf %18, %17 : vector<1x136xf32>
    %20 = arith.addf %16, %19 : vector<1x136xf32>
    %21 = vector.extract_strided_slice %15 {offsets = [0, 121], sizes = [1, 136], strides = [1, 1]} : vector<1x384xf32> to vector<1x136xf32>
    %cst_8 = arith.constant 7.500000e-02 : f32
    %22 = vector.broadcast %cst_8 : f32 to vector<1x136xf32>
    %23 = arith.mulf %22, %21 : vector<1x136xf32>
    %24 = arith.addf %20, %23 : vector<1x136xf32>
    %25 = vector.extract_strided_slice %15 {offsets = [0, 122], sizes = [1, 136], strides = [1, 1]} : vector<1x384xf32> to vector<1x136xf32>
    %cst_9 = arith.constant 1.000000e-01 : f32
    %26 = vector.broadcast %cst_9 : f32 to vector<1x136xf32>
    %27 = arith.mulf %26, %25 : vector<1x136xf32>
    %28 = arith.addf %24, %27 : vector<1x136xf32>
    %29 = vector.extract_strided_slice %15 {offsets = [0, 123], sizes = [1, 136], strides = [1, 1]} : vector<1x384xf32> to vector<1x136xf32>
    %cst_10 = arith.constant 1.750000e-01 : f32
    %30 = vector.broadcast %cst_10 : f32 to vector<1x136xf32>
    %31 = arith.mulf %30, %29 : vector<1x136xf32>
    %32 = arith.addf %28, %31 : vector<1x136xf32>
    %33 = vector.extract_strided_slice %15 {offsets = [0, 124], sizes = [1, 136], strides = [1, 1]} : vector<1x384xf32> to vector<1x136xf32>
    %cst_11 = arith.constant 2.000000e-01 : f32
    %34 = vector.broadcast %cst_11 : f32 to vector<1x136xf32>
    %35 = arith.mulf %34, %33 : vector<1x136xf32>
    %36 = arith.addf %32, %35 : vector<1x136xf32>
    %37 = vector.extract_strided_slice %15 {offsets = [0, 125], sizes = [1, 136], strides = [1, 1]} : vector<1x384xf32> to vector<1x136xf32>
    %cst_12 = arith.constant 1.750000e-01 : f32
    %38 = vector.broadcast %cst_12 : f32 to vector<1x136xf32>
    %39 = arith.mulf %38, %37 : vector<1x136xf32>
    %40 = arith.addf %36, %39 : vector<1x136xf32>
    %41 = vector.extract_strided_slice %15 {offsets = [0, 126], sizes = [1, 136], strides = [1, 1]} : vector<1x384xf32> to vector<1x136xf32>
    %cst_13 = arith.constant 1.000000e-01 : f32
    %42 = vector.broadcast %cst_13 : f32 to vector<1x136xf32>
    %43 = arith.mulf %42, %41 : vector<1x136xf32>
    %44 = arith.addf %40, %43 : vector<1x136xf32>
    %45 = vector.extract_strided_slice %15 {offsets = [0, 127], sizes = [1, 136], strides = [1, 1]} : vector<1x384xf32> to vector<1x136xf32>
    %cst_14 = arith.constant 7.500000e-02 : f32
    %46 = vector.broadcast %cst_14 : f32 to vector<1x136xf32>
    %47 = arith.mulf %46, %45 : vector<1x136xf32>
    %48 = arith.addf %44, %47 : vector<1x136xf32>
    %49 = vector.extract_strided_slice %15 {offsets = [0, 128], sizes = [1, 136], strides = [1, 1]} : vector<1x384xf32> to vector<1x136xf32>
    %cst_15 = arith.constant 5.000000e-02 : f32
    %50 = vector.broadcast %cst_15 : f32 to vector<1x136xf32>
    %51 = arith.mulf %50, %49 : vector<1x136xf32>
    %52 = arith.addf %48, %51 : vector<1x136xf32>
    %53 = tpu.iota {dimensions = array<i32: 1>} : vector<1x136xi32>
    %c4_i32 = arith.constant 4 : i32
    %54 = arith.subi %0, %c4_i32 : i32
    %55 = vector.broadcast %54 : i32 to vector<1x136xi32>
    %56 = arith.addi %55, %53 : vector<1x136xi32>
    %c0_i32_16 = arith.constant 0 : i32
    %57 = vector.broadcast %c0_i32_16 : i32 to vector<1x136xi32>
    %58 = arith.cmpi sge, %56, %57 : vector<1x136xi32>
    %c300_i32_17 = arith.constant 300 : i32
    %59 = vector.broadcast %c300_i32_17 : i32 to vector<1x136xi32>
    %60 = arith.cmpi slt, %56, %59 : vector<1x136xi32>
    %61 = arith.andi %58, %60 : vector<1x136xi1>
    %cst_18 = arith.constant 0.000000e+00 : f32
    %62 = vector.broadcast %cst_18 : f32 to vector<1x136xf32>
    %63 = arith.select %61, %52, %62 : vector<1x136xi1>, vector<1x136xf32>
    %cst_19 = arith.constant 0.000000e+00 : f32
    %64 = vector.broadcast %cst_19 : f32 to vector<1x128xf32>
    %65 = vector.extract_strided_slice %63 {offsets = [0, 0], sizes = [1, 128], strides = [1, 1]} : vector<1x136xf32> to vector<1x128xf32>
    %cst_20 = arith.constant 5.000000e-02 : f32
    %66 = vector.broadcast %cst_20 : f32 to vector<1x128xf32>
    %67 = arith.mulf %66, %65 : vector<1x128xf32>
    %68 = arith.addf %64, %67 : vector<1x128xf32>
    %69 = vector.extract_strided_slice %63 {offsets = [0, 1], sizes = [1, 128], strides = [1, 1]} : vector<1x136xf32> to vector<1x128xf32>
    %cst_21 = arith.constant 7.500000e-02 : f32
    %70 = vector.broadcast %cst_21 : f32 to vector<1x128xf32>
    %71 = arith.mulf %70, %69 : vector<1x128xf32>
    %72 = arith.addf %68, %71 : vector<1x128xf32>
    %73 = vector.extract_strided_slice %63 {offsets = [0, 2], sizes = [1, 128], strides = [1, 1]} : vector<1x136xf32> to vector<1x128xf32>
    %cst_22 = arith.constant 1.000000e-01 : f32
    %74 = vector.broadcast %cst_22 : f32 to vector<1x128xf32>
    %75 = arith.mulf %74, %73 : vector<1x128xf32>
    %76 = arith.addf %72, %75 : vector<1x128xf32>
    %77 = vector.extract_strided_slice %63 {offsets = [0, 3], sizes = [1, 128], strides = [1, 1]} : vector<1x136xf32> to vector<1x128xf32>
    %cst_23 = arith.constant 1.750000e-01 : f32
    %78 = vector.broadcast %cst_23 : f32 to vector<1x128xf32>
    %79 = arith.mulf %78, %77 : vector<1x128xf32>
    %80 = arith.addf %76, %79 : vector<1x128xf32>
    %81 = vector.extract_strided_slice %63 {offsets = [0, 4], sizes = [1, 128], strides = [1, 1]} : vector<1x136xf32> to vector<1x128xf32>
    %cst_24 = arith.constant 2.000000e-01 : f32
    %82 = vector.broadcast %cst_24 : f32 to vector<1x128xf32>
    %83 = arith.mulf %82, %81 : vector<1x128xf32>
    %84 = arith.addf %80, %83 : vector<1x128xf32>
    %85 = vector.extract_strided_slice %63 {offsets = [0, 5], sizes = [1, 128], strides = [1, 1]} : vector<1x136xf32> to vector<1x128xf32>
    %cst_25 = arith.constant 1.750000e-01 : f32
    %86 = vector.broadcast %cst_25 : f32 to vector<1x128xf32>
    %87 = arith.mulf %86, %85 : vector<1x128xf32>
    %88 = arith.addf %84, %87 : vector<1x128xf32>
    %89 = vector.extract_strided_slice %63 {offsets = [0, 6], sizes = [1, 128], strides = [1, 1]} : vector<1x136xf32> to vector<1x128xf32>
    %cst_26 = arith.constant 1.000000e-01 : f32
    %90 = vector.broadcast %cst_26 : f32 to vector<1x128xf32>
    %91 = arith.mulf %90, %89 : vector<1x128xf32>
    %92 = arith.addf %88, %91 : vector<1x128xf32>
    %93 = vector.extract_strided_slice %63 {offsets = [0, 7], sizes = [1, 128], strides = [1, 1]} : vector<1x136xf32> to vector<1x128xf32>
    %cst_27 = arith.constant 7.500000e-02 : f32
    %94 = vector.broadcast %cst_27 : f32 to vector<1x128xf32>
    %95 = arith.mulf %94, %93 : vector<1x128xf32>
    %96 = arith.addf %92, %95 : vector<1x128xf32>
    %97 = vector.extract_strided_slice %63 {offsets = [0, 8], sizes = [1, 128], strides = [1, 1]} : vector<1x136xf32> to vector<1x128xf32>
    %cst_28 = arith.constant 5.000000e-02 : f32
    %98 = vector.broadcast %cst_28 : f32 to vector<1x128xf32>
    %99 = arith.mulf %98, %97 : vector<1x128xf32>
    %100 = arith.addf %96, %99 : vector<1x128xf32>
    %c0_29 = arith.constant 0 : index
    %c0_30 = arith.constant 0 : index
    %101 = vector.load %arg4[%c0_29, %c0_30] : memref<1x128xf32, #tpu.memory_space<vmem>>, vector<1x128xf32>
    tpu.vector_store %arg4[%c0_29, %c0_30], %100 {strides = array<i32>} : memref<1x128xf32, #tpu.memory_space<vmem>>, vector<1x128xf32>,
    return
  }
  func.func @transform_0(%arg0: i32) -> (i32, i32) {
    %c1_i32 = arith.constant 1 : i32
    %0 = arith.muli %arg0, %c1_i32 : i32
    %c1_i32_0 = arith.constant 1 : i32
    %1 = arith.subi %0, %c1_i32_0 : i32
    %c0_i32 = arith.constant 0 : i32
    %2 = arith.maxsi %1, %c0_i32 : i32
    %c0_i32_1 = arith.constant 0 : i32
    %c0_i32_2 = arith.constant 0 : i32
    return %c0_i32_1, %2 : i32, i32
  }
  func.func @transform_1(%arg0: i32) -> (i32, i32) {
    %c0_i32 = arith.constant 0 : i32
    %c0_i32_0 = arith.constant 0 : i32
    return %c0_i32, %arg0 : i32, i32
  }
  func.func @transform_2(%arg0: i32) -> (i32, i32) {
    %c1_i32 = arith.constant 1 : i32
    %0 = arith.addi %arg0, %c1_i32 : i32
    %c1_i32_0 = arith.constant 1 : i32
    %1 = arith.muli %0, %c1_i32_0 : i32
    %c2_i32 = arith.constant 2 : i32
    %2 = arith.minsi %1, %c2_i32 : i32
    %c0_i32 = arith.constant 0 : i32
    %c0_i32_1 = arith.constant 0 : i32
    return %c0_i32, %2 : i32, i32
  }
  func.func @transform_3(%arg0: i32) -> (i32, i32) {
    %c0_i32 = arith.constant 0 : i32
    %c0_i32_0 = arith.constant 0 : i32
    return %c0_i32, %arg0 : i32, i32
  }
}

</mosaic_0001>

<bundles_post_ra>
// kernel: tpu_custom_call.1
= control target key start
LH: loop header
LB: loop body
LE: loop exit
PB: predicated region body
PF: predicated region fallthrough
CT: control target
= control target key end

     0   :  { %8 = vsyncpa [#allocation3], 0  ;;  %s1130_s0 = inlined_call_operand.hbm [shape: f32[1,384], index: 0, kind: input, shape index: {}]   ;;  %s1131_s1 = inlined_call_operand.vmem [shape: f32[1,384], index: 1, kind: input, shape index: {}]   ;;  %s1132_s2 = inlined_call_operand.vmem [shape: f32[1,384], index: 2, kind: input, shape index: {}]   ;;  %s1133_s3 = inlined_call_operand.hbm [shape: f32[1,384], index: 3, kind: output, shape index: {}]  }
   0x1   :  { %10 = vsyncpa [#allocation3 + $0x1], 0 }
   0x2   :  { %11 = vsyncpa [#allocation4], 0 }
   0x3   :  { %13 = vsyncpa [#allocation4 + $0x1], 0  ;;  %s843_s12 = smov 0   ;;  %s845_s13 = smov 0  }
   0x4   :  { %s847_s14 = smov 0   ;;  %s849_s15 = smov 0  }
   0x5   :  { %s851_s16 = smov 0   ;;  %s853_s17 = smov 0  }
   0x6   :  { %s855_s18 = smov 0  }
   0x7 LB: > { %s877_s19 = sadd.s32 4294967295, %s810_s18   ;;  %s594_s20 = sadd.s32 4294967294, %s810_s18   ;;  %s810_s18 = sphi %s855_s18, %s1151_s18   ;;  %s806_s17 = sphi %s853_s17, %s1150_s17   ;;  %s802_s16 = sphi %s851_s16, %s1149_s16   ;;  %s798_s15 = sphi %s849_s15, %s1148_s15   ;;  %s794_s14 = sphi %s847_s14, %s1147_s14   ;;  %s790_s13 = sphi %s845_s13, %s1146_s13   ;;  %s786_s12 = sphi %s843_s12, %s1145_s12  }
   0x8   : > { %s881_s21 = sadd.s32 1, %s810_s18   ;;  %p24_p0 = scmp.gt.s32.totalorder %s877_s19, 0 }
   0x9   : > { %s596_s22 = sadd.s32 4294967295, %s881_s21  ;;  %s32_s23 = sadd.s32 1, %s806_s17 }
   0xa   : > { %s25_s24 = scalar_select %p24_p0, %s877_s19, 0 }
   0xb   : > { %p27_p1 = scmp.gt.s32.totalorder %s596_s22, 0  ;;  %p39_p2 = scmp.ne.s32.totalorder %s806_s17, %s802_s16 }
   0xc   : > { %p40_p3 = scmp.eq.s32.totalorder %s810_s18, 0  ;;  %p45_p4 = scmp.ne.s32.totalorder %s802_s16, %s798_s15 }
   0xd   : > { %s1153_s22 = smov (!%p27_p1, %s596_s22), 0  ;;  %p46_p6 = scmp.eq.s32.totalorder %s877_s19, 0 }
   0xe   : > { %p891_p5 = por %p40_p3, %p39_p2  ;;  %s29_s26 = ssub.s32 %s25_s24, %s1153_s22 }
   0xf   : > { %s113_s27 = ssub.s32 %s810_s18, %s881_s21  ;;  %p30_p7 = scmp.eq.s32.totalorder %s29_s26, 0 }
  0x10   : > { %p898_p8 = por %p46_p6, %p45_p4  ;;  %p114_p9 = scmp.eq.s32.totalorder %s113_s27, 0 }
  0x11   : > { %s116_s29 = sadd.s32 1, %s794_s14  ;;  %p126_p10 = scmp.ne.s32.totalorder %s794_s14, %s790_s13 }
  0x12   : > { %s904_s30 = scalar_select %p30_p7, %s806_s17, %s32_s23  }
  0x13   : > { %s907_s4 = scalar_select %p114_p9, %s794_s14, %s116_s29  }
  0x14   : > { %p127_p11 = scmp.eq.s32.totalorder %s877_s19, 2  ;;  %p132_p12 = scmp.ne.s32.totalorder %s790_s13, %s786_s12 }
  0x15   : > { %p133_p13 = scmp.eq.s32.totalorder %s594_s20, 2  ;;  %p623_p2 = scmp.lt.s32.totalorder %s810_s18, 3 }
  0x16   : > { %p914_p0 = por %p127_p11, %p126_p10  ;;  %s153_s7 = sand.u32 1, %s806_s17  }
  0x17   : > { %p918_p1 = por %p133_p13, %p132_p12  ;;  %s600_s8 = sshll.u32 %s25_s24, 4 }
  0x18   : > { %s1137_s5 = scalar_select %p914_p0, 1, 0 }
  0x19   : > { %s1138_s6 = scalar_select %p918_p1, 1, 0 }
  0x1a   : > { %s927_s11 = scalar_lea.hbm %s1130_s0, %s600_s8  ;;  %s156_s15 = scalar_lea.vmem [#allocation2], %s153_s7 }
  0x1b   : > { %s166_s20 = sshll.u32 %s156_s15, 4  ;;  %p933_p3 = pnand %p623_p2, %p891_p5  ;;  %s929_s20 = int_to_ptr.vmem [resolvable:$true] %s166_s20 }
  0x1c   : > { %s154_s23 = scalar_lea.sflag [#allocation3], %s153_s7  ;;  %s690_s24 = scalar_lea.hbm %s927_s11, 16 }
  0x1d   : > { %p691_p7 = scmp.ne.s32.totalorder %s927_s11, %s690_s24  ;;  %p692_p9 = pneg %p933_p3 }
  0x1e   : > { %s695_s25 = scalar_lea.hbm %s1130_s0, 48  ;;  %p696_p5 = scmp.lt.u32.totalorder %s927_s11, %s1130_s0 }
  0x1f   : > { %p693_p10 = pnand %p692_p9, %p691_p7  ;;  %p697_p12 = scmp.lt.u32.totalorder %s695_s25, %s690_s24 }
  0x20   : > { %p699_p2 = scmp.lt.u32.totalorder %s690_s24, %s927_s11 }
  0x21   : > { %p694_p11 = pneg %p693_p10  ;;  %p698_p13 = por %p697_p12, %p696_p5 }
  0x23   : > { %p700_p4 = por %p699_p2, %p698_p13 }
  0x25   : > { %p701_p6 = pnand %p700_p4, %p694_p11 }
  0x27   : > { %704 = shalt.err (!%p701_p6)
}
  0x28   : > { %s705_s7 = scalar_lea.vmem %s929_s20, 16  ;;  %s812_s9 = smov [#allocation2]  }
  0x29   : > { %p706_p7 = scmp.ne.s32.totalorder %s929_s20, %s705_s7  ;;  %s710_s10 = sshll.u32 %s812_s9, 4  ;;  %s711_s10 = int_to_ptr.vmem [resolvable:$false] %s710_s10 }
  0x2a   : > { %s712_s15 = scalar_lea.vmem %s711_s10, 32  ;;  %p713_p0 = scmp.lt.s32.totalorder %s929_s20, %s711_s10 }
  0x2b   : > { %p708_p10 = pnand %p706_p7, %p692_p9  ;;  %p714_p5 = scmp.lt.s32.totalorder %s712_s15, %s705_s7 }
  0x2d   : > { %p709_p1 = pneg %p708_p10  ;;  %p715_p12 = por %p714_p5, %p713_p0 }
  0x2f   : > { %p716_p13 = pnand %p715_p12, %p709_p1 }
  0x31   : > { %719 = shalt.err (!%p716_p13)
}
  0x32   : > { %618 = dma.hbm_to_vmem [thread:$0]  (!%p933_p3), %s927_s11, 16, %s929_s20, %s154_s23  }
  0x33   : > { %p1140_p4 = scmp.lt.s32.totalorder %s810_s18, 4  ;;  %p1141_p6 = scmp.ge.s32.totalorder %s810_s18, 1 }
  0x35   : > { %p190_p9 = pnand %p1141_p6, %p1140_p4 }
  0x36   : > { %s195_s24 = sand.u32 (!%p190_p9), 1, %s802_s16  }
  0x37   : > { %193 = sbr.rel (%p190_p9) target bundleno = 515 (0x203), region = 32  ;;  %s196_s26 = scalar_lea.sflag (!%p190_p9), [#allocation3], %s195_s24 }
  0x38   : > { %s198_s27 = scalar_lea.vmem (!%p190_p9), [#allocation2], %s195_s24 }
  0x3e   : > { %777 = dma.done.wait (%p898_p8), %s196_s26, 16  }
  0x3f   : > { %779 = vsyncadd (%p898_p8), %s196_s26, 4294967280  ;;  %s605_s11 = sshll.u32 %s877_s19, 7  ;;  %v247_v0 = vlaneseq  ;;  %s234_s22 = sadd.s32 1, %s877_s19  ;;  %v244_v8 = vld [vmem:[%s198_s27] sm:$0x1]  ;;  %vm284_vm9 = vcmask 1039360  }
  0x40   : > { %s606_s20 = sadd.s32 4294967168, %s605_s11  ;;  %p979_p0 = scmp.lt.s32.totalorder %s234_s22, 2  ;;  %vm303_vm10 = vcmask 1031168   ;;  %vm322_vm11 = vcmask 1022976   ;;  %vm341_vm12 = vcmask 1014784   ;;  %vm354_vm13 = vcmask 1006592  }
  0x41   : > { %v976_v1 = vand.u32 127, %v247_v0  ;;  %v252_v2 = vstv %s606_s20  ;;  %p231_p8 = scmp.lt.s32.totalorder %s877_s19, 2  ;;  %s813_s15 = smov 126   ;;  %vm367_vm14 = vcmask 998400   ;;  %vm380_vm15 = vcmask 990208  }
  0x42   : > { %s1155_s22 = smov (!%p979_p0, %s234_s22), 2  ;;  %s814_s24 = smov 127  }
  0x43   : > { %v253_v3 = vadd.s32 %v252_v2, %v976_v1  ;;  %v250_v4 = vadd.s32 256, %v976_v1  ;;  %v987_v5 = vadd.s32 128, %v976_v1  ;;  %s232_s28 = scalar_select %p231_p8, %s877_s19, 2 }
  0x44   : > { %s1157_s22 = smov (!%p979_p0, %s1155_s22), 2  ;;  %s815_s26 = smov 125  }
  0x45   : > { %vm256_vm0 = vcmp.ge.s32.totalorder %v253_v3, 0  ;;  %vm259_vm1 = vcmp.lt.s32.totalorder %v253_v3, 300  ;;  %v255_v6 = vadd.s32 %v252_v2, %v250_v4  ;;  %v254_v7 = vadd.s32 %v252_v2, %v987_v5  ;;  %s233_s8 = scalar_lea.vmem %s1131_s1, %s232_s28  ;;  %s239_s10 = scalar_lea.vmem %s1132_s2, %s1157_s22 }
  0x46   : > { %vm262_vm2 = vmand %vm256_vm0, %vm259_vm1  ;;  %v246_v12 = vld [vmem:[%s239_s10] sm:$0x1]  ;;  %s816_s27 = smov 124   ;;  %s817_s20 = smov 123   ;;  %vm394_vm0 = vcmask 982016  }
  0x47   : > { %v995_v9 = vsel %vm262_vm2, %v244_v8, 0.0  ;;  %vm258_vm3 = vcmp.ge.s32.totalorder %v255_v6, 0  ;;  %vm261_vm4 = vcmp.lt.s32.totalorder %v255_v6, 300  ;;  %vm257_vm5 = vcmp.ge.s32.totalorder %v254_v7, 0  ;;  %v245_v13 = vld [vmem:[%s233_s8] sm:$0x1] }
  0x48   : > { %v291_v10 = vmul.f32 0.1, %v995_v9  ;;  %v272_v11 = vmul.f32 0.075, %v995_v9  ;;  %vm264_vm6 = vmand %vm258_vm3, %vm261_vm4  ;;  %vm260_vm7 = vcmp.lt.s32.totalorder %v254_v7, 300  ;;  %s818_s22 = smov 122  }
  0x49   : > { %v267_v14 = vsel %vm264_vm6, %v246_v12, 0.0  ;;  %v310_v15 = vmul.f32 0.175, %v995_v9  ;;  %vm263_vm8 = vmand %vm257_vm5, %vm260_vm7  ;;  %v329_v22 = vmul.f32 0.2, %v995_v9  ;;  %s819_s23 = smov 121  }
  0x4a   : > { %297 = vrot.lane.b32.xlu1 %v291_v10, %s813_s15  ;;  %278 = vrot.lane.b32.xlu0 %v272_v11, %s814_s24  ;;  %v274_v16 = vmul.f32 0.075, %v267_v14  ;;  %v266_v17 = vsel %vm263_vm8, %v245_v13, 0.0  ;;  %v293_v18 = vmul.f32 0.1, %v267_v14  ;;  %s820_s28 = smov 120  }
  0x4b   : > { %v273_v19 = vmul.f32 0.075, %v266_v17  ;;  %v311_v20 = vmul.f32 0.175, %v266_v17  ;;  %v292_v21 = vmul.f32 0.1, %v266_v17 }
  0x4c   : > { %v312_v23 = vmul.f32 0.175, %v267_v14  ;;  %v331_v24 = vmul.f32 0.2, %v267_v14  ;;  %v330_v25 = vmul.f32 0.2, %v266_v17 }
  0x4d   : > { %v269_v26 = vmul.f32 0.05, %v266_v17  ;;  %v387_v27 = vmul.f32 0.05, %v267_v14  ;;  %v268_v38 = vmul.f32 0.05, %v995_v9 }
  0x4e   : > { %282 = vrot.lane.b32.xlu1 %v274_v16, %s814_s24  ;;  %316 = vrot.lane.b32.xlu0 %v310_v15, %s815_s26  ;;  %s821_s25 = smov 8   ;;  %s607_s29 = sadd.s32 4294967292, %s605_s11  ;;  %vm416_vm6 = vcmask 64512  }
  0x4f   : > { %s226_s11 = sand.u32 1, %s790_s13   ;;  %s608_s8 = sshll.u32 %s877_s19, 4 }
  0x50   : > { %s227_s7 = scalar_lea.vmem [#allocation5], %s226_s11  ;;  %p1143_p3 = scmp.ne.s32.totalorder %s1137_s5, 0 }
  0x51   : > { %s513_s9 = sshll.u32 %s227_s7, 4  ;;  %s1081_s9 = int_to_ptr.vmem [resolvable:$true] %s513_s9 }
  0x52   : > { %301 = vrot.lane.b32.xlu1 %v293_v18, %s813_s15  ;;  %280 = vrot.lane.b32.xlu0 %v273_v19, %s814_s24  ;;  %s720_s19 = scalar_lea.vmem %s1081_s9, 16 }
  0x53   : > { %p721_p1 = scmp.ne.s32.totalorder %s1081_s9, %s720_s19 }
  0x55   : > { %p722_p11 = pnand %p721_p1, %p1143_p3 }
  0x56   : > { %318 = vrot.lane.b32.xlu1 %v311_v20, %s815_s26  ;;  %299 = vrot.lane.b32.xlu0 %v292_v21, %s813_s15 }
  0x57   : > { %p723_p2 = pneg %p722_p11 }
  0x5a   : > { %335 = vrot.lane.b32.xlu1 %v329_v22, %s816_s27  ;;  %320 = vrot.lane.b32.xlu0 %v312_v23, %s815_s26 }
  0x5e   : > { %339 = vrot.lane.b32.xlu1 %v331_v24, %s816_s27  ;;  %337 = vrot.lane.b32.xlu0 %v330_v25, %s816_s27 }
  0x62   : > { %350 = vrot.lane.b32.xlu1 %v311_v20, %s817_s20  ;;  %348 = vrot.lane.b32.xlu0 %v310_v15, %s817_s20 }
  0x66   : > { %361 = vrot.lane.b32.xlu1 %v291_v10, %s818_s22  ;;  %352 = vrot.lane.b32.xlu0 %v312_v23, %s817_s20 }
  0x6a   : > { %365 = vrot.lane.b32.xlu1 %v293_v18, %s818_s22  ;;  %363 = vrot.lane.b32.xlu0 %v292_v21, %s818_s22  ;;  %v401_v21 = vstv %s607_s29 }
  0x6b   : > { %v403_v22 = vadd.s32 %v401_v21, %v987_v5  ;;  %v402_v23 = vadd.s32 %v401_v21, %v976_v1 }
  0x6d   : > { %vm405_vm1 = vcmp.ge.s32.totalorder %v403_v22, 0  ;;  %vm407_vm2 = vcmp.lt.s32.totalorder %v403_v22, 300  ;;  %vm404_vm3 = vcmp.ge.s32.totalorder %v402_v23, 0  ;;  %vm406_vm4 = vcmp.lt.s32.totalorder %v402_v23, 300 }
  0x6e   : > { %376 = vrot.lane.b32.xlu1 %v273_v19, %s819_s23  ;;  %374 = vrot.lane.b32.xlu0 %v272_v11, %s819_s23  ;;  %vm409_vm5 = vmand %vm405_vm1, %vm407_vm2 }
  0x6f   : > { %vm408_vm7 = vmand %vm404_vm3, %vm406_vm4 }
  0x72   : > { %390 = vrot.lane.b32.xlu1 %v269_v26, %s820_s28  ;;  %378 = vrot.lane.b32.xlu0 %v274_v16, %s819_s23 }
  0x76   : > { %392 = vrot.lane.b32.xlu0 %v387_v27, %s820_s28 }
  0xbc   : > { %v298_v28 = vpop.permute.xlu1 %297  ;;  %v279_v29 = vpop.permute.xlu0 %278 }
  0xc0   : > { %v283_v30 = vpop.permute.xlu1 %282  ;;  %v317_v31 = vpop.permute.xlu0 %316 }
  0xc4   : > { %v302_v32 = vpop.permute.xlu1 %301  ;;  %v281_v33 = vpop.permute.xlu0 %280 }
  0xc5   : > { %v285_v41 = vsel %vm284_vm9, %v279_v29, %v281_v33  ;;  %v286_v49 = vsel %vm284_vm9, %v281_v33, %v283_v30 }
  0xc6   : > { %v289_v43 = vadd.f32 %v285_v41, %v268_v38  ;;  %v290_v55 = vadd.f32 %v286_v49, %v269_v26 }
  0xc8   : > { %v319_v34 = vpop.permute.xlu1 %318  ;;  %v300_v35 = vpop.permute.xlu0 %299 }
  0xc9   : > { %v304_v42 = vsel %vm303_vm10, %v298_v28, %v300_v35  ;;  %v323_v50 = vsel %vm322_vm11, %v317_v31, %v319_v34  ;;  %v305_v53 = vsel %vm303_vm10, %v300_v35, %v302_v32 }
  0xca   : > { %v308_v46 = vadd.f32 %v304_v42, %v289_v43  ;;  %v309_v61 = vadd.f32 %v305_v53, %v290_v55 }
  0xcc   : > { %v336_v36 = vpop.permute.xlu1 %335  ;;  %v321_v37 = vpop.permute.xlu0 %320  ;;  %v327_v52 = vadd.f32 %v323_v50, %v308_v46 }
  0xcd   : > { %v324_v59 = vsel %vm322_vm11, %v319_v34, %v321_v37 }
  0xce   : > { %v328_v0 = vadd.f32 %v324_v59, %v309_v61 }
  0xd0   : > { %v340_v39 = vpop.permute.xlu1 %339  ;;  %v338_v40 = vpop.permute.xlu0 %337 }
  0xd1   : > { %v342_v51 = vsel %vm341_vm12, %v336_v36, %v338_v40  ;;  %v343_v63 = vsel %vm341_vm12, %v338_v40, %v340_v39 }
  0xd2   : > { %v346_v56 = vadd.f32 %v342_v51, %v327_v52  ;;  %v347_v8 = vadd.f32 %v343_v63, %v328_v0 }
  0xd4   : > { %v351_v44 = vpop.permute.xlu1 %350  ;;  %v349_v45 = vpop.permute.xlu0 %348 }
  0xd5   : > { %v355_v54 = vsel %vm354_vm13, %v349_v45, %v351_v44 }
  0xd6   : > { %v359_v62 = vadd.f32 %v355_v54, %v346_v56 }
  0xd8   : > { %v362_v47 = vpop.permute.xlu1 %361  ;;  %v353_v48 = vpop.permute.xlu0 %352 }
  0xd9   : > { %v356_v6 = vsel %vm354_vm13, %v351_v44, %v353_v48 }
  0xda   : > { %v360_v11 = vadd.f32 %v356_v6, %v347_v8 }
  0xdc   : > { %v366_v57 = vpop.permute.xlu1 %365  ;;  %v364_v58 = vpop.permute.xlu0 %363 }
  0xdd   : > { %v368_v60 = vsel %vm367_vm14, %v362_v47, %v364_v58  ;;  %v369_v10 = vsel %vm367_vm14, %v364_v58, %v366_v57 }
  0xde   : > { %v372_v2 = vadd.f32 %v368_v60, %v359_v62  ;;  %v373_v16 = vadd.f32 %v369_v10, %v360_v11 }
  0xe0   : > { %v377_v3 = vpop.permute.xlu1 %376  ;;  %v375_v4 = vpop.permute.xlu0 %374 }
  0xe1   : > { %v381_v7 = vsel %vm380_vm15, %v375_v4, %v377_v3 }
  0xe2   : > { %v385_v9 = vadd.f32 %v381_v7, %v372_v2 }
  0xe4   : > { %v391_v12 = vpop.permute.xlu1 %390  ;;  %v379_v13 = vpop.permute.xlu0 %378 }
  0xe5   : > { %v398_v14 = vadd.f32 %v391_v12, %v385_v9  ;;  %v382_v15 = vsel %vm380_vm15, %v377_v3, %v379_v13 }
  0xe6   : > { %v386_v17 = vadd.f32 %v382_v15, %v373_v16 }
  0xe7   : > { %412 = vrot.lane.b32.xlu1 %v398_v14, %s821_s25 }
  0xe8   : > { %v393_v18 = vpop.permute.xlu0 %392 }
  0xe9   : > { %v395_v19 = vsel %vm394_vm0, %v391_v12, %v393_v18 }
  0xea   : > { %v399_v20 = vadd.f32 %v395_v19, %v386_v17 }
  0xec   : > { %414 = vrot.lane.b32.xlu0 %v399_v20, %s821_s25 }
 0x159   : > { %v413_v24 = vpop.permute.xlu1 %412 }
 0x15e   : > { %v415_v25 = vpop.permute.xlu0 %414 }
 0x15f   : > { %v417_v26 = vsel %vm416_vm6, %v413_v24, %v415_v25  ;;  %v421_v27 = vsel %vm409_vm5, %v415_v25, 0.0 }
 0x160   : > { %v420_v28 = vsel %vm408_vm7, %v417_v26, 0.0  ;;  %v425_v29 = vmul.f32 0.075, %v421_v27  ;;  %v436_v5 = vmul.f32 0.1, %v421_v27 }
 0x161   : > { %v424_v30 = vmul.f32 0.075, %v420_v28  ;;  %v435_v1 = vmul.f32 0.1, %v420_v28  ;;  %v447_v31 = vmul.f32 0.175, %v421_v27 }
 0x162   : > { %430 = vrot.lane.b32.xlu0 %v425_v29, %s814_s24  ;;  %v446_v32 = vmul.f32 0.175, %v420_v28  ;;  %v458_v33 = vmul.f32 0.2, %v421_v27  ;;  %v457_v34 = vmul.f32 0.2, %v420_v28 }
 0x163   : > { %428 = vrot.lane.b32.xlu1 %v424_v30, %s814_s24  ;;  %v489_v35 = vmul.f32 0.05, %v421_v27  ;;  %v422_v36 = vmul.f32 0.05, %v420_v28  ;;  %s1079_s24 = scalar_lea.hbm %s1133_s3, %s608_s8 }
 0x166   : > { %441 = vrot.lane.b32.xlu0 %v436_v5, %s813_s15 }
 0x167   : > { %439 = vrot.lane.b32.xlu1 %v435_v1, %s813_s15 }
 0x16a   : > { %452 = vrot.lane.b32.xlu0 %v447_v31, %s815_s26 }
 0x16b   : > { %450 = vrot.lane.b32.xlu1 %v446_v32, %s815_s26  ;;  %s501_s26 = scalar_lea.sflag [#allocation4], %s226_s11 }
 0x16e   : > { %463 = vrot.lane.b32.xlu0 %v458_v33, %s816_s27 }
 0x16f   : > { %461 = vrot.lane.b32.xlu1 %v457_v34, %s816_s27  ;;  %s822_s27 = smov [#allocation5]  }
 0x172   : > { %470 = vrot.lane.b32.xlu0 %v447_v31, %s817_s20 }
 0x173   : > { %468 = vrot.lane.b32.xlu1 %v446_v32, %s817_s20  ;;  %s724_s20 = sshll.u32 %s822_s27, 4  ;;  %s725_s20 = int_to_ptr.vmem [resolvable:$false] %s724_s20 }
 0x174   : > { %p727_p7 = scmp.lt.s32.totalorder %s1081_s9, %s725_s20 }
 0x176   : > { %477 = vrot.lane.b32.xlu0 %v436_v5, %s818_s22 }
 0x177   : > { %475 = vrot.lane.b32.xlu1 %v435_v1, %s818_s22  ;;  %s726_s22 = scalar_lea.vmem %s725_s20, 32 }
 0x178   : > { %p728_p10 = scmp.lt.s32.totalorder %s726_s22, %s720_s19 }
 0x17a   : > { %484 = vrot.lane.b32.xlu0 %v425_v29, %s819_s23  ;;  %p729_p5 = por %p728_p10, %p727_p7 }
 0x17b   : > { %482 = vrot.lane.b32.xlu1 %v424_v30, %s819_s23 }
 0x17c   : > { %p730_p12 = pnand %p729_p5, %p723_p2 }
 0x17e   : > { %494 = vrot.lane.b32.xlu0 %v489_v35, %s820_s28 }
 0x17f   : > { %492 = vrot.lane.b32.xlu1 %v422_v36, %s820_s28 }
 0x1d4   : > { %v431_v37 = vpop.permute.xlu0 %430 }
 0x1d5   : > { %v429_v38 = vpop.permute.xlu1 %428 }
 0x1d6   : > { %v432_v45 = vsel %vm284_vm9, %v429_v38, %v431_v37 }
 0x1d7   : > { %v434_v48 = vadd.f32 %v432_v45, %v422_v36 }
 0x1d8   : > { %v442_v39 = vpop.permute.xlu0 %441 }
 0x1d9   : > { %v440_v40 = vpop.permute.xlu1 %439 }
 0x1da   : > { %v443_v46 = vsel %vm303_vm10, %v440_v40, %v442_v39 }
 0x1db   : > { %v445_v51 = vadd.f32 %v443_v46, %v434_v48 }
 0x1dc   : > { %v453_v41 = vpop.permute.xlu0 %452 }
 0x1dd   : > { %v451_v42 = vpop.permute.xlu1 %450 }
 0x1de   : > { %v454_v50 = vsel %vm322_vm11, %v451_v42, %v453_v41 }
 0x1df   : > { %v456_v54 = vadd.f32 %v454_v50, %v445_v51 }
 0x1e0   : > { %v464_v43 = vpop.permute.xlu0 %463 }
 0x1e1   : > { %v462_v44 = vpop.permute.xlu1 %461 }
 0x1e2   : > { %v465_v52 = vsel %vm341_vm12, %v462_v44, %v464_v43 }
 0x1e3   : > { %v467_v57 = vadd.f32 %v465_v52, %v456_v54 }
 0x1e4   : > { %v471_v47 = vpop.permute.xlu0 %470 }
 0x1e5   : > { %v469_v49 = vpop.permute.xlu1 %468 }
 0x1e6   : > { %v472_v56 = vsel %vm354_vm13, %v469_v49, %v471_v47 }
 0x1e7   : > { %v474_v60 = vadd.f32 %v472_v56, %v467_v57 }
 0x1e8   : > { %v478_v53 = vpop.permute.xlu0 %477 }
 0x1e9   : > { %v476_v55 = vpop.permute.xlu1 %475 }
 0x1ea   : > { %v479_v58 = vsel %vm367_vm14, %v476_v55, %v478_v53 }
 0x1eb   : > { %v481_v63 = vadd.f32 %v479_v58, %v474_v60 }
 0x1ec   : > { %v485_v59 = vpop.permute.xlu0 %484 }
 0x1ed   : > { %v483_v61 = vpop.permute.xlu1 %482 }
 0x1ee   : > { %v486_v62 = vsel %vm380_vm15, %v483_v61, %v485_v59 }
 0x1ef   : > { %v488_v2 = vadd.f32 %v486_v62, %v481_v63 }
 0x1f0   : > { %v495_v0 = vpop.permute.xlu0 %494 }
 0x1f1   : > { %v493_v3 = vpop.permute.xlu1 %492 }
 0x1f2   : > { %v496_v4 = vsel %vm394_vm0, %v493_v3, %v495_v0 }
 0x1f3   : > { %v498_v6 = vadd.f32 %v496_v4, %v488_v2 }
 0x1f5   : > { %499 = vst [vmem:[%s227_s7] sm:$0x1] %v498_v6 }
 0x1f6   : > { %733 = shalt.err (!%p730_p12)
}
 0x1f7   : > { %s734_s23 = scalar_lea.hbm %s1079_s24, 16  ;;  %s738_s29 = scalar_lea.hbm %s1133_s3, 48 }
 0x1f8   : > { %p735_p13 = scmp.ne.s32.totalorder %s1079_s24, %s734_s23  ;;  %p739_p9 = scmp.lt.u32.totalorder %s1079_s24, %s1133_s3 }
 0x1f9   : > { %p740_p0 = scmp.lt.u32.totalorder %s738_s29, %s734_s23  ;;  %p742_p1 = scmp.lt.u32.totalorder %s734_s23, %s1079_s24 }
 0x1fa   : > { %p736_p4 = pnand %p735_p13, %p1143_p3 }
 0x1fb   : > { %p741_p8 = por %p740_p0, %p739_p9 }
 0x1fc   : > { %p737_p6 = pneg %p736_p4 }
 0x1fd   : > { %p743_p11 = por %p742_p1, %p741_p8 }
 0x1ff   : > { %p744_p2 = pnand %p743_p11, %p737_p6 }
 0x201   : > { %747 = shalt.err (!%p744_p2)
}
 0x202   : > { %613 = dma.vmem_to_hbm [thread:$0]  (%p1143_p3), %s1081_s9, 16, %s1079_s24, %s501_s26  }
 0x203 PF: > { %p624_p7 = scmp.ge.s32.totalorder %s810_s18, 2  ;;  %s525_s7 = sand.u32 1, %s786_s12  }
 0x204   : > { %p1144_p10 = scmp.ne.s32.totalorder %s1138_s6, 0  ;;  %s526_s10 = scalar_lea.sflag [#allocation4], %s525_s7 }
 0x206   : > { %p620_p5 = pnand %p624_p7, %p1144_p10 }
 0x208   : > { %781 = dma.done.wait (!%p620_p5), %s526_s10, 16  }
 0x209   : > { %783 = vsyncadd (!%p620_p5), %s526_s10, 4294967280  ;;  %p16_p3 = scmp.ge.s32.totalorder %s881_s21, 5   ;;  %s1145_s12 = smov %s790_s13 }
 0x20a   : > { %s1146_s13 = smov %s794_s14  ;;  %s1147_s14 = smov %s907_s4 }
 0x20b   : > { %s1148_s15 = smov %s802_s16  ;;  %s1149_s16 = smov %s806_s17 }
 0x20c   : > { %s1150_s17 = smov %s904_s30  ;;  %s1151_s18 = smov %s881_s21 }
 0x20d   :  { %18 = sbr.rel (!%p16_p3) target bundleno = 7 (0x7), region = 83 }
 0x214   :  { %530 = vsyncpa [#allocation3], 1 }
 0x215   :  { %532 = vsyncpa [#allocation3 + $0x1], 1 }
 0x216   :  { %533 = vsyncpa [#allocation4], 1 }
 0x217   :  { %535 = vsyncpa [#allocation4 + $0x1], 1 }

</bundles_post_ra>
